<compile_context>
chip_gen: v6e
topology: v6e:2x2x1
jax: 0.10.0
libtpu: 0.0.40
codegen_flags: <defaults>
</compile_context>

<pallas_src>
import numpy as np
import jax
import jax.numpy as jnp
from jax.experimental import pallas as pl
from jax.experimental.pallas import tpu as pltpu


def _round_up(a: int, b: int) -> int:
    return ((a + b - 1) // b) * b


def _largest_div_mult128(n: int, cap: int) -> int | None:
    """Largest multiple of 128 that divides n and is <= cap (None if none)."""
    best = None
    t = 128
    while t <= min(n, cap):
        if n % t == 0:
            best = t
        t += 128
    return best


# ----------------------------------------------------------------------------
# Mask construction (mirrors RectAverage.__init__ exactly, plain numpy glue).
# ----------------------------------------------------------------------------
def build_rect_masks(image_size: int) -> np.ndarray:
    w, h = image_size, image_size
    pyramid = np.zeros([w - 1, h - 1])
    x = pyramid.shape[0]
    for i in range(x // 2 + 1):
        v = x // 2 - i
        for j in range(i, x - i):
            for k in range(i, x - i):
                pyramid[j, k] = v
    plane = np.ones([w, h]) * (w // 2)
    plane[1:, 1:] = pyramid
    masks = []
    for r in range(image_size // 2 + 1):
        px, py = np.where(plane == r)
        mask_plane = np.zeros((w, h))
        mask_plane[px, py] = 1
        masks.append(mask_plane)
    return np.stack(masks, axis=0).astype(np.float32)   # (L, H, W)


# ----------------------------------------------------------------------------
# Static folded weight: luminance coeffs * 20x scale * mask / ring size.
# ----------------------------------------------------------------------------
def build_rect_weight(mask_np: np.ndarray, num_channels: int) -> np.ndarray:
    """W of shape (C*H*W, L): W[c*HW + hw, l] = 20*coeff[c]*mask[l,hw]/nbin[l]."""
    L, H, W = mask_np.shape
    HW = H * W
    m = mask_np.reshape(L, HW).astype(np.float64)
    nbin = m.sum(axis=1)                                  # (L,) ring sizes
    if num_channels == 3:
        coeff = np.array([0.299, 0.587, 0.114], dtype=np.float64)
    elif num_channels == 1:
        coeff = np.array([1.0], dtype=np.float64)
    else:
        raise ValueError(
            f"RectAverage only_psd path supports C in {{1, 3}}, got C={num_channels}")
    w_lhw = 20.0 * m / nbin[:, None]                      # (L, HW)
    w = coeff[:, None, None] * w_lhw.T[None, :, :]        # (C, HW, L)
    return w.reshape(num_channels * HW, L).astype(np.float32)


# ----------------------------------------------------------------------------
# Pallas kernel: tiled matmul accumulating directly into the f32 output block.
# ----------------------------------------------------------------------------
def rect_profile_kernel(x_ref, w_ref, out_ref):
    k = pl.program_id(1)

    @pl.when(k == 0)
    def _init():
        out_ref[...] = jnp.zeros_like(out_ref)

    out_ref[...] += jnp.dot(x_ref[...], w_ref[...],
                            preferred_element_type=jnp.float32)


# ----------------------------------------------------------------------------
# Tile-size selection
# ----------------------------------------------------------------------------
def _pick_tb(B: int) -> tuple[int, int]:
    """Returns (tb, B_pad).  Prefers: no padding, >=2 batch tiles (v7x
    megacore) when B allows it, tb <= 256, minimal pad waste otherwise."""
    if B % 8 == 0:
        best = 8
        t = 8
        while t <= min(B, 256):
            if B % t == 0 and (B // t >= 2 or B <= 8):
                best = t
            t += 8
        return best, B
    if B <= 256:
        # Single batch tile equal to the full dim: legal, no padded copy of x.
        return B, B
    # Awkward large B: pad to a multiple of 8 (small copy; masked ragged tiles
    # would need pl.BoundedSlice machinery not worth it here).
    B_pad = _round_up(B, 8)
    best = 8
    t = 8
    while t <= min(B_pad, 256):
        if B_pad % t == 0 and B_pad // t >= 2:
            best = t
        t += 8
    return best, B_pad


def _pick_tk(K: int, cap: int) -> tuple[int, int]:
    """Returns (tk, K_pad) with tk | K_pad and tk legal as a block dim."""
    if K % 128 == 0:
        return (_largest_div_mult128(K, cap) or 128), K
    if K <= cap:
        return K, K          # single K tile == full dim: legal, no pad
    K_pad = _round_up(K, 128)
    return (_largest_div_mult128(K_pad, cap) or 128), K_pad


# ----------------------------------------------------------------------------
# Wrapper
# ----------------------------------------------------------------------------
def rect_average(x: jax.Array, weight: jax.Array, *,
                 stream_bf16: bool = False) -> jax.Array:
    """x: (B, C, H, W), weight: (C*H*W, L) folded weight -> (B, L) float32."""
    B, C, H, W = x.shape
    K, L = weight.shape
    assert K == C * H * W, "weight must match C*H*W"

    # bf16 inputs stay bf16; f32 inputs stream bf16 only if explicitly asked
    # (quantizes below 1e-4 accuracy). Accumulation is always f32.
    if x.dtype == jnp.bfloat16 or stream_bf16:
        compute_dtype = jnp.bfloat16
    else:
        compute_dtype = jnp.float32
    itemsize = jnp.dtype(compute_dtype).itemsize

    cap_k = 4096 if compute_dtype == jnp.bfloat16 else 2048
    tb, B_pad = _pick_tb(B)
    tk, K_pad = _pick_tk(K, cap_k)

    x2d = x.reshape(B, K).astype(compute_dtype)
    w_c = weight.astype(compute_dtype)

    # Only materialize padded copies when strictly required.
    if B_pad != B or K_pad != K:
        x_in = jnp.zeros((B_pad, K_pad), compute_dtype).at[:B, :K].set(x2d)
    else:
        x_in = x2d
    if K_pad != K:
        w_in = jnp.zeros((K_pad, L), compute_dtype).at[:K, :].set(w_c)
    else:
        w_in = w_c

    n_btiles = B_pad // tb
    cost = pl.CostEstimate(
        flops=2 * B_pad * K_pad * L,
        transcendentals=0,
        bytes_accessed=(B_pad * K_pad * itemsize                 # x once
                        + n_btiles * K_pad * L * itemsize        # W per batch tile
                        + B_pad * L * 4),                        # output
    )

    prof_pad = pl.pallas_call(
        rect_profile_kernel,
        out_shape=jax.ShapeDtypeStruct((B_pad, L), jnp.float32),
        grid_spec=pltpu.PrefetchScalarGridSpec(
            num_scalar_prefetch=0,
            grid=(B_pad // tb, K_pad // tk),
            in_specs=[
                pl.BlockSpec((tb, tk), lambda i, k: (i, k)),
                pl.BlockSpec((tk, L), lambda i, k: (k, 0)),   # L == full dim
            ],
            out_specs=pl.BlockSpec((tb, L), lambda i, k: (i, 0)),
        ),
        compiler_params=pltpu.CompilerParams(
            dimension_semantics=("parallel", "arbitrary"),
        ),
        cost_estimate=cost,
    )(x_in, w_in)

    prof = prof_pad[:B, :]
    # Global min-max over the whole (B, L) matrix, matching the PyTorch module.
    # NOTE: a constant profile gives pmax == pmin -> Inf/NaN, same as the module.
    pmin = jnp.min(prof)
    pmax = jnp.max(prof)
    return (prof - pmin) / (pmax - pmin)


# ----------------------------------------------------------------------------
# Pure-numpy reference (matches the PyTorch forward, only_psd=True)
# ----------------------------------------------------------------------------
def rect_average_ref(x: np.ndarray, mask: np.ndarray) -> np.ndarray:
    if x.shape[1] == 3:
        mag = 0.299 * x[:, 0] + 0.587 * x[:, 1] + 0.114 * x[:, 2]
    else:
        mag = x[:, 0]
    mag = 20.0 * mag                                         # (B, H, W)
    prof = (mag[:, None] * mask[None]).sum((2, 3))           # (B, L)
    prof = prof / mask.sum((1, 2))[None, :]
    return (prof - prof.min()) / (prof.max() - prof.min())


if __name__ == "__main__":
    image_size = 16
    B, C = 2, 3

    mask_np = build_rect_masks(image_size)                   # (9, 16, 16)
    weight_np = build_rect_weight(mask_np, C)                # (C*HW, 9)
    weight = jnp.asarray(weight_np)                          # built once, reused

    key = jax.random.PRNGKey(0)
    x = jax.random.normal(key, (B, C, image_size, image_size), dtype=jnp.float32)

    out = rect_average(x, weight)
    out = jax.block_until_ready(out)

    ref = rect_average_ref(np.asarray(x), mask_np)
    assert out.shape == (B, image_size // 2 + 1)
    np.testing.assert_allclose(np.asarray(out), ref, rtol=1e-4, atol=1e-4)

    print("KERNEL_OK")
</pallas_src>

<mosaic_0001>
module attributes {stable_mosaic.version = 11 : i64} {
  func.func @rect_profile_kernel(%arg0: i32, %arg1: i32, %arg2: memref<2x768xf32, #tpu.memory_space<vmem>>, %arg3: memref<768x9xf32, #tpu.memory_space<vmem>>, %arg4: memref<2x9xf32, #tpu.memory_space<vmem>>) attributes {dimension_semantics = [#tpu.dimension_semantics<parallel>, #tpu.dimension_semantics<arbitrary>], iteration_bounds = array<i64: 1, 1>, scalar_prefetch = 0 : i64, scratch_operands = 0 : i64, tpu.core_type = #tpu.core_type<tc>, window_params = [{transform_indices = @transform_0, window_bounds = array<i64: 2, 768>}, {transform_indices = @transform_1, window_bounds = array<i64: 768, 9>}, {transform_indices = @transform_2, window_bounds = array<i64: 2, 9>}]} {
    %c0_i32 = arith.constant 0 : i32
    %0 = arith.cmpi eq, %arg1, %c0_i32 : i32
    %1 = arith.extui %0 : i1 to i32
    %c0_i32_0 = arith.constant 0 : i32
    %2 = arith.cmpi ne, %1, %c0_i32_0 : i32
    scf.if %2 {
      %cst_8 = arith.constant 0.000000e+00 : f32
      %9 = vector.broadcast %cst_8 : f32 to vector<2x9xf32>
      %c0_9 = arith.constant 0 : index
      %c0_10 = arith.constant 0 : index
      %10 = vector.load %arg4[%c0_9, %c0_10] : memref<2x9xf32, #tpu.memory_space<vmem>>, vector<2x9xf32>
      tpu.vector_store %arg4[%c0_9, %c0_10], %9 {strides = array<i32>} : memref<2x9xf32, #tpu.memory_space<vmem>>, vector<2x9xf32>,
    } else {
    }
    %c0 = arith.constant 0 : index
    %c0_1 = arith.constant 0 : index
    %3 = vector.load %arg4[%c0, %c0_1] : memref<2x9xf32, #tpu.memory_space<vmem>>, vector<2x9xf32>
    %c0_2 = arith.constant 0 : index
    %c0_3 = arith.constant 0 : index
    %4 = vector.load %arg2[%c0_2, %c0_3] : memref<2x768xf32, #tpu.memory_space<vmem>>, vector<2x768xf32>
    %c0_4 = arith.constant 0 : index
    %c0_5 = arith.constant 0 : index
    %5 = vector.load %arg3[%c0_4, %c0_5] : memref<768x9xf32, #tpu.memory_space<vmem>>, vector<768x9xf32>
    %cst = arith.constant dense<0.000000e+00> : vector<2x9xf32>
    %6 = tpu.matmul %4, %5, %cst {dimension_numbers = #tpu.dot_dimension_numbers<[1], [0], [0], [1], [0, 0, 1, 1], [], []>} : vector<2x768xf32>, vector<768x9xf32>, vector<2x9xf32> -> vector<2x9xf32>
    %7 = arith.addf %3, %6 : vector<2x9xf32>
    %c0_6 = arith.constant 0 : index
    %c0_7 = arith.constant 0 : index
    %8 = vector.load %arg4[%c0_6, %c0_7] : memref<2x9xf32, #tpu.memory_space<vmem>>, vector<2x9xf32>
    tpu.vector_store %arg4[%c0_6, %c0_7], %7 {strides = array<i32>} : memref<2x9xf32, #tpu.memory_space<vmem>>, vector<2x9xf32>,
    return
  }
  func.func @transform_0(%arg0: i32, %arg1: i32) -> (i32, i32) {
    %c0_i32 = arith.constant 0 : i32
    return %arg0, %arg1 : i32, i32
  }
  func.func @transform_1(%arg0: i32, %arg1: i32) -> (i32, i32) {
    %c0_i32 = arith.constant 0 : i32
    %c0_i32_0 = arith.constant 0 : i32
    return %arg1, %c0_i32 : i32, i32
  }
  func.func @transform_2(%arg0: i32, %arg1: i32) -> (i32, i32) {
    %c0_i32 = arith.constant 0 : i32
    %c0_i32_0 = arith.constant 0 : i32
    return %arg0, %c0_i32 : i32, i32
  }
}

</mosaic_0001>

<bundles_post_ra>
// kernel: tpu_custom_call.1
= control target key start
LH: loop header
LB: loop body
LE: loop exit
PB: predicated region body
PF: predicated region fallthrough
CT: control target
= control target key end

     0   :  { %v509_v30 = vmov 1983009808   ;;  %v123_v32 = vlaneseq  ;;  %s831_s0 = inlined_call_operand.vmem [shape: f32[2,768], index: 0, kind: input, shape index: {}]   ;;  %s832_s1 = inlined_call_operand.vmem [shape: f32[768,9], index: 1, kind: input, shape index: {}]   ;;  %s833_s2 = inlined_call_operand.hbm [shape: f32[2,9], index: 2, kind: output, shape index: {}]  }
   0x1   :  { %v52_v0 = vld [vmem:[%s832_s1 + $0xf8] sm:$0xff]  ;;  %v51_v4 = vld [vmem:[%s832_s1 + $0xf0] sm:$0xff]  ;;  %v50_v8 = vld [vmem:[%s832_s1 + $0xe8] sm:$0xff]  ;;  %v121_v31 = vunpack.c.l.s4 %v509_v30 }
   0x2   :  { %v84_v1 = vld [vmem:[%s832_s1 + $0x1f8] sm:$0xff]  ;;  %378 = vmatprep.subr.mxu0 %v52_v0  ;;  %v83_v5 = vld [vmem:[%s832_s1 + $0x1f0] sm:$0xff]  ;;  %v82_v9 = vld [vmem:[%s832_s1 + $0x1e8] sm:$0xff]  ;;  %v124_v42 = vshrl.u32 %v123_v32, 7 }
   0x3   :  { %v36_v2 = vld [vmem:[%s832_s1 + $0x78] sm:$0xff]  ;;  %413 = vmatprep.subr.mxu1 %v84_v1  ;;  %v35_v6 = vld [vmem:[%s832_s1 + $0x70] sm:$0xff]  ;;  %v34_v10 = vld [vmem:[%s832_s1 + $0x68] sm:$0xff]  ;;  %v122_v41 = vunpack.c.0.s8 %v121_v31 }
   0x4   :  { %v68_v3 = vld [vmem:[%s832_s1 + $0x178] sm:$0xff]  ;;  %379 = vmatpush3.msra.mxu0 %v36_v2  ;;  %v67_v7 = vld [vmem:[%s832_s1 + $0x170] sm:$0xff]  ;;  %v66_v11 = vld [vmem:[%s832_s1 + $0x168] sm:$0xff] }
   0x5   :  { %414 = vmatpush3.msra.mxu1 %v68_v3  ;;  %380 = vmatprep.subr.mxu0 %v51_v4  ;;  %v49_v12 = vld [vmem:[%s832_s1 + $0xe0] sm:$0xff]  ;;  %v48_v16 = vld [vmem:[%s832_s1 + $0xd8] sm:$0xff]  ;;  %v47_v20 = vld [vmem:[%s832_s1 + $0xd0] sm:$0xff]  ;;  %v125_v51 = vsub.s32 %v122_v41, %v124_v42 }
   0x6   :  { %415 = vmatprep.subr.mxu1 %v83_v5  ;;  %381 = vmatpush3.msra.mxu0 %v35_v6  ;;  %v81_v13 = vld [vmem:[%s832_s1 + $0x1e0] sm:$0xff]  ;;  %v80_v17 = vld [vmem:[%s832_s1 + $0x1d8] sm:$0xff]  ;;  %v79_v21 = vld [vmem:[%s832_s1 + $0x1d0] sm:$0xff] }
   0x7   :  { %416 = vmatpush3.msra.mxu1 %v67_v7  ;;  %382 = vmatprep.subr.mxu0 %v50_v8  ;;  %v33_v14 = vld [vmem:[%s832_s1 + $0x60] sm:$0xff]  ;;  %v32_v18 = vld [vmem:[%s832_s1 + $0x58] sm:$0xff]  ;;  %v31_v22 = vld [vmem:[%s832_s1 + $0x50] sm:$0xff] }
   0x8   :  { %417 = vmatprep.subr.mxu1 %v82_v9  ;;  %v65_v15 = vld [vmem:[%s832_s1 + $0x160] sm:$0xff]  ;;  %383 = vmatpush3.msra.mxu0 %v34_v10  ;;  %v64_v19 = vld [vmem:[%s832_s1 + $0x158] sm:$0xff]  ;;  %v63_v23 = vld [vmem:[%s832_s1 + $0x150] sm:$0xff] }
   0x9   :  { %418 = vmatpush3.msra.mxu1 %v66_v11  ;;  %384 = vmatprep.subr.mxu0 %v49_v12  ;;  %v46_v24 = vld [vmem:[%s832_s1 + $0xc8] sm:$0xff]  ;;  %v45_v28 = vld [vmem:[%s832_s1 + $0xc0] sm:$0xff]  ;;  %v44_v35 = vld [vmem:[%s832_s1 + $0xb8] sm:$0xff] }
   0xa   :  { %419 = vmatprep.subr.mxu1 %v81_v13  ;;  %385 = vmatpush3.msra.mxu0 %v33_v14  ;;  %v78_v25 = vld [vmem:[%s832_s1 + $0x1c8] sm:$0xff]  ;;  %v77_v29 = vld [vmem:[%s832_s1 + $0x1c0] sm:$0xff]  ;;  %v76_v36 = vld [vmem:[%s832_s1 + $0x1b8] sm:$0xff] }
   0xb   :  { %420 = vmatpush3.msra.mxu1 %v65_v15  ;;  %386 = vmatprep.subr.mxu0 %v48_v16  ;;  %v30_v26 = vld [vmem:[%s832_s1 + $0x48] sm:$0xff]  ;;  %v29_v33 = vld [vmem:[%s832_s1 + $0x40] sm:$0xff]  ;;  %v28_v37 = vld [vmem:[%s832_s1 + $0x38] sm:$0xff] }
   0xc   :  { %421 = vmatprep.subr.mxu1 %v80_v17  ;;  %387 = vmatpush3.msra.mxu0 %v32_v18  ;;  %v62_v27 = vld [vmem:[%s832_s1 + $0x148] sm:$0xff]  ;;  %v61_v34 = vld [vmem:[%s832_s1 + $0x140] sm:$0xff]  ;;  %v60_v38 = vld [vmem:[%s832_s1 + $0x138] sm:$0xff] }
   0xd   :  { %422 = vmatpush3.msra.mxu1 %v64_v19  ;;  %388 = vmatprep.subr.mxu0 %v47_v20  ;;  %v43_v39 = vld [vmem:[%s832_s1 + $0xb0] sm:$0xff]  ;;  %v42_v45 = vld [vmem:[%s832_s1 + $0xa8] sm:$0xff]  ;;  %v41_v49 = vld [vmem:[%s832_s1 + $0xa0] sm:$0xff] }
   0xe   :  { %423 = vmatprep.subr.mxu1 %v79_v21  ;;  %389 = vmatpush3.msra.mxu0 %v31_v22  ;;  %v75_v40 = vld [vmem:[%s832_s1 + $0x1b0] sm:$0xff]  ;;  %v74_v46 = vld [vmem:[%s832_s1 + $0x1a8] sm:$0xff]  ;;  %v73_v50 = vld [vmem:[%s832_s1 + $0x1a0] sm:$0xff] }
   0xf   :  { %424 = vmatpush3.msra.mxu1 %v63_v23  ;;  %390 = vmatprep.subr.mxu0 %v46_v24  ;;  %v27_v43 = vld [vmem:[%s832_s1 + $0x30] sm:$0xff]  ;;  %v26_v47 = vld [vmem:[%s832_s1 + $0x28] sm:$0xff]  ;;  %v25_v52 = vld [vmem:[%s832_s1 + $0x20] sm:$0xff] }
  0x10   :  { %425 = vmatprep.subr.mxu1 %v78_v25  ;;  %391 = vmatpush3.msra.mxu0 %v30_v26  ;;  %v59_v44 = vld [vmem:[%s832_s1 + $0x130] sm:$0xff]  ;;  %v58_v48 = vld [vmem:[%s832_s1 + $0x128] sm:$0xff]  ;;  %v57_v53 = vld [vmem:[%s832_s1 + $0x120] sm:$0xff] }
  0x11   :  { %426 = vmatpush3.msra.mxu1 %v62_v27  ;;  %392 = vmatprep.subr.mxu0 %v45_v28  ;;  %v19_v54 = vld [vmem:[%s831_s0] sm:$0xff]  ;;  %v40_v55 = vld [vmem:[%s832_s1 + $0x98] sm:$0xff]  ;;  %v39_v60 = vld [vmem:[%s832_s1 + $0x90] sm:$0xff] }
  0x12   :  { %427 = vmatprep.subr.mxu1 %v77_v29  ;;  %393 = vmatpush3.msra.mxu0 %v29_v33  ;;  %v72_v56 = vld [vmem:[%s832_s1 + $0x198] sm:$0xff]  ;;  %v119_v57 = vcombine.high %v19_v54, %v19_v54  ;;  %v71_v61 = vld [vmem:[%s832_s1 + $0x190] sm:$0xff]  ;;  %v126_v62 = vrot.slane %v19_v54, %v125_v51  ;;  %v38_v2 = vld [vmem:[%s832_s1 + $0x88] sm:$0xff] }
  0x13   :  { %428 = vmatpush3.msra.mxu1 %v61_v34  ;;  %394 = vmatprep.subr.mxu0 %v44_v35  ;;  %v24_v58 = vld [vmem:[%s832_s1 + $0x18] sm:$0xff]  ;;  %v23_v63 = vld [vmem:[%s832_s1 + $0x10] sm:$0xff]  ;;  %v70_v3 = vld [vmem:[%s832_s1 + $0x188] sm:$0xff] }
  0x14   :  { %429 = vmatprep.subr.mxu1 %v76_v36  ;;  %395 = vmatpush3.msra.mxu0 %v28_v37  ;;  %v56_v59 = vld [vmem:[%s832_s1 + $0x118] sm:$0xff]  ;;  %v55_v0 = vld [vmem:[%s832_s1 + $0x110] sm:$0xff]  ;;  %v133_v1 = vrot.slane %v119_v57, %v125_v51  ;;  %v22_v4 = vld [vmem:[%s832_s1 + $0x8] sm:$0xff]  ;;  %v134_v8 = vcombine.high %v126_v62, %v126_v62 }
  0x15   :  { %430 = vmatpush3.msra.mxu1 %v60_v38  ;;  %396 = vmatprep.subr.mxu0 %v43_v39  ;;  %v54_v5 = vld [vmem:[%s832_s1 + $0x108] sm:$0xff]  ;;  %v37_v6 = vld [vmem:[%s832_s1 + $0x80] sm:$0xff]  ;;  %v116_v12 = vld [vmem:[%s832_s1 + $0x2f8] sm:$0xff] }
  0x16   :  { %431 = vmatprep.subr.mxu1 %v75_v40  ;;  %397 = vmatpush3.msra.mxu0 %v27_v43  ;;  %v69_v7 = vld [vmem:[%s832_s1 + $0x180] sm:$0xff]  ;;  %v135_v10 = vcombine.high %v133_v1, %v133_v1  ;;  %v728_v13 = vld.sshfl [vmem:[%s831_s0 + $0x8] sm:$0x33 pattern:$0x76325410]  ;;  %v100_v14 = vld [vmem:[%s832_s1 + $0x278] sm:$0xff] }
  0x17   :  { %432 = vmatpush3.msra.mxu1 %v59_v44  ;;  %398 = vmatprep.subr.mxu0 %v42_v45  ;;  %v21_v9 = vld [vmem:[%s832_s1] sm:$0xff]  ;;  %v143_v15 = vcombine.high %v728_v13, %v728_v13 }
  0x18   :  { %433 = vmatprep.subr.mxu1 %v74_v46  ;;  %399 = vmatpush3.msra.mxu0 %v26_v47  ;;  %v53_v11 = vld [vmem:[%s832_s1 + $0x100] sm:$0xff] }
  0x19   :  { %434 = vmatpush3.msra.mxu1 %v58_v48  ;;  %400 = vmatprep.subr.mxu0 %v41_v49 }
  0x1a   :  { %435 = vmatprep.subr.mxu1 %v73_v50  ;;  %401 = vmatpush3.msra.mxu0 %v25_v52 }
  0x1b   :  { %436 = vmatpush3.msra.mxu1 %v57_v53  ;;  %402 = vmatprep.subr.mxu0 %v40_v55 }
  0x1c   :  { %437 = vmatprep.subr.mxu1 %v72_v56  ;;  %403 = vmatpush3.msra.mxu0 %v24_v58 }
  0x1d   :  { %438 = vmatpush3.msra.mxu1 %v56_v59  ;;  %404 = vmatprep.subr.mxu0 %v39_v60 }
  0x1e   :  { %439 = vmatprep.subr.mxu1 %v71_v61  ;;  %405 = vmatpush3.msra.mxu0 %v23_v63 }
  0x1f   :  { %440 = vmatpush3.msra.mxu1 %v55_v0  ;;  %406 = vmatprep.subr.mxu0 %v38_v2 }
  0x20   :  { %441 = vmatprep.subr.mxu1 %v70_v3  ;;  %407 = vmatpush3.msra.mxu0 %v22_v4 }
  0x21   :  { %442 = vmatpush3.msra.mxu1 %v54_v5  ;;  %408 = vmatprep.subr.mxu0 %v37_v6 }
  0x22   :  { %443 = vmatprep.subr.mxu1 %v69_v7  ;;  %409 = vmatpush3.msra.mxu0 %v21_v9 }
  0x23   :  { %214 = vmatprep.mubr.f32.mxu0 %v134_v8  ;;  %444 = vmatpush3.msra.mxu1 %v53_v11 }
  0x24   :  { %284 = vmatprep.mubr.f32.mxu1 %v135_v10 }
  0x25   :  { %7 = vsyncpa [#allocation3], 0  ;;  %215 = vmatmul.mubr.f32.vlgmr.msra.gmra.mxu0 %v126_v62  ;;  %285 = vmatmul.mubr.f32.vlgmr.msra.gmra.mxu1 %v133_v1  ;;  %v115_v16 = vld [vmem:[%s832_s1 + $0x2f0] sm:$0xff]  ;;  %v114_v18 = vld [vmem:[%s832_s1 + $0x2e8] sm:$0xff]  ;;  %vm16_vm0 = vcmask 66560   ;;  %v510_v46 = vmov 0.0  }
  0x26   :  { %448 = vmatprep.subr.mxu0 %v116_v12  ;;  %v99_v17 = vld [vmem:[%s832_s1 + $0x270] sm:$0xff]  ;;  %354 = vmatprep.mubr.f32.mxu0 %v143_v15  ;;  %v98_v19 = vld [vmem:[%s832_s1 + $0x268] sm:$0xff]  ;;  %v113_v20 = vld [vmem:[%s832_s1 + $0x2e0] sm:$0xff]  ;;  %17 = vst.msk [vmem:[#allocation2] sm:$0x3] %vm16_vm0, %v510_v46 }
  0x27   :  { %449 = vmatpush3.msra.mxu0 %v100_v14  ;;  %v97_v21 = vld [vmem:[%s832_s1 + $0x260] sm:$0xff]  ;;  %v112_v22 = vld [vmem:[%s832_s1 + $0x2d8] sm:$0xff]  ;;  %v111_v24 = vld [vmem:[%s832_s1 + $0x2d0] sm:$0xff] }
  0x28   :  { %450 = vmatprep.subr.mxu0 %v115_v16  ;;  %v96_v23 = vld [vmem:[%s832_s1 + $0x258] sm:$0xff]  ;;  %v95_v25 = vld [vmem:[%s832_s1 + $0x250] sm:$0xff]  ;;  %v110_v26 = vld [vmem:[%s832_s1 + $0x2c8] sm:$0xff] }
  0x29   :  { %451 = vmatpush3.msra.mxu0 %v99_v17  ;;  %v94_v27 = vld [vmem:[%s832_s1 + $0x248] sm:$0xff]  ;;  %v109_v28 = vld [vmem:[%s832_s1 + $0x2c0] sm:$0xff]  ;;  %v108_v30 = vld [vmem:[%s832_s1 + $0x2b8] sm:$0xff] }
  0x2a   :  { %452 = vmatprep.subr.mxu0 %v114_v18  ;;  %v93_v29 = vld [vmem:[%s832_s1 + $0x240] sm:$0xff]  ;;  %v92_v31 = vld [vmem:[%s832_s1 + $0x238] sm:$0xff]  ;;  %v107_v32 = vld [vmem:[%s832_s1 + $0x2b0] sm:$0xff] }
  0x2b   :  { %453 = vmatpush3.msra.mxu0 %v98_v19  ;;  %v91_v33 = vld [vmem:[%s832_s1 + $0x230] sm:$0xff]  ;;  %v106_v34 = vld [vmem:[%s832_s1 + $0x2a8] sm:$0xff]  ;;  %v105_v36 = vld [vmem:[%s832_s1 + $0x2a0] sm:$0xff] }
  0x2c   :  { %454 = vmatprep.subr.mxu0 %v113_v20  ;;  %v90_v35 = vld [vmem:[%s832_s1 + $0x228] sm:$0xff]  ;;  %v89_v37 = vld [vmem:[%s832_s1 + $0x220] sm:$0xff]  ;;  %v104_v38 = vld [vmem:[%s832_s1 + $0x298] sm:$0xff] }
  0x2d   :  { %455 = vmatpush3.msra.mxu0 %v97_v21  ;;  %v88_v39 = vld [vmem:[%s832_s1 + $0x218] sm:$0xff]  ;;  %v103_v40 = vld [vmem:[%s832_s1 + $0x290] sm:$0xff]  ;;  %v102_v42 = vld [vmem:[%s832_s1 + $0x288] sm:$0xff] }
  0x2e   :  { %456 = vmatprep.subr.mxu0 %v112_v22  ;;  %v87_v41 = vld [vmem:[%s832_s1 + $0x210] sm:$0xff]  ;;  %v86_v43 = vld [vmem:[%s832_s1 + $0x208] sm:$0xff]  ;;  %v101_v44 = vld [vmem:[%s832_s1 + $0x280] sm:$0xff] }
  0x2f   :  { %457 = vmatpush3.msra.mxu0 %v96_v23  ;;  %v85_v45 = vld [vmem:[%s832_s1 + $0x200] sm:$0xff]  ;;  %s511_s1 = smov [#allocation2]  }
  0x30   :  { %458 = vmatprep.subr.mxu0 %v111_v24  ;;  %v18_v57 = vld [vmem:[#allocation2] sm:$0x3]  ;;  %s369_s7 = sshll.u32 %s511_s1, 4  ;;  %s370_s7 = int_to_ptr.vmem [resolvable:$true] %s369_s7 }
  0x31   :  { %459 = vmatpush3.msra.mxu0 %v95_v25  ;;  %s487_s0 = scalar_lea.vmem %s370_s7, 32  ;;  %p492_p1 = scmp.lt.s32.totalorder %s370_s7, %s370_s7 }
  0x32   :  { %460 = vmatprep.subr.mxu0 %v110_v26  ;;  %p488_p0 = scmp.ne.s32.totalorder %s370_s7, %s487_s0  ;;  %p493_p2 = scmp.lt.s32.totalorder %s487_s0, %s487_s0 }
  0x33   :  { %461 = vmatpush3.msra.mxu0 %v94_v27 }
  0x34   :  { %462 = vmatprep.subr.mxu0 %v109_v28  ;;  %p494_p3 = por %p493_p2, %p492_p1 }
  0x35   :  { %463 = vmatpush3.msra.mxu0 %v93_v29 }
  0x36   :  { %464 = vmatprep.subr.mxu0 %v108_v30  ;;  %p495_p4 = pnand %p494_p3, %p488_p0 }
  0x37   :  { %465 = vmatpush3.msra.mxu0 %v92_v31 }
  0x38   :  { %466 = vmatprep.subr.mxu0 %v107_v32 }
  0x39   :  { %467 = vmatpush3.msra.mxu0 %v91_v33 }
  0x3a   :  { %468 = vmatprep.subr.mxu0 %v106_v34 }
  0x3b   :  { %469 = vmatpush3.msra.mxu0 %v90_v35 }
  0x3c   :  { %470 = vmatprep.subr.mxu0 %v105_v36 }
  0x3d   :  { %471 = vmatpush3.msra.mxu0 %v89_v37 }
  0x3e   :  { %472 = vmatprep.subr.mxu0 %v104_v38 }
  0x3f   :  { %473 = vmatpush3.msra.mxu0 %v88_v39 }
  0x40   :  { %474 = vmatprep.subr.mxu0 %v103_v40 }
  0x41   :  { %475 = vmatpush3.msra.mxu0 %v87_v41 }
  0x42   :  { %476 = vmatprep.subr.mxu0 %v102_v42 }
  0x43   :  { %477 = vmatpush3.msra.mxu0 %v86_v43 }
  0x44   :  { %478 = vmatprep.subr.mxu0 %v101_v44 }
  0x45   :  { %479 = vmatpush3.msra.mxu0 %v85_v45 }
  0x46   :  { %355 = vmatmul.mubr.f32.vlgmr.msra.gmra.mxu0 %v728_v13 }
  0xe5   :  { %v410_v47 = vpop.f32.mrf.mxu0  ;;  %v445_v48 = vpop.f32.mrf.mxu1 }
  0xe7   :  { %v411_v49 = vpop.f32.mrf.mxu0  ;;  %v446_v50 = vpop.f32.mrf.mxu1 }
  0xe8   :  { %v412_v51 = vadd.f32 %v411_v49, %v410_v47  ;;  %v447_v52 = vadd.f32 %v446_v50, %v445_v48 }
  0xea   :  { %v287_v55 = vadd.f32 %v447_v52, %v412_v51 }
 0x106   :  { %v480_v53 = vpop.f32.mrf.mxu0 }
 0x108   :  { %v481_v54 = vpop.f32.mrf.mxu0 }
 0x109   :  { %v482_v56 = vadd.f32 %v481_v54, %v480_v53 }
 0x10b   :  { %v357_v58 = vadd.f32 %v482_v56, %v287_v55 }
 0x10d   :  { %v360_v59 = vadd.f32 %v357_v58, %v18_v57 }
 0x10f   :  { %362 = vst.msk [vmem:[#allocation2] sm:$0x3] %vm16_vm0, %v360_v59 }
 0x110   :  { %498 = shalt.err (!%p495_p4)
}
 0x111   :  { %372 = dma.vmem_to_hbm [thread:$0]  %s370_s7, 32, %s833_s2, [#allocation3]  }
 0x112   :  { %507 = dma.done.wait [#allocation3], 32  }
 0x113   :  { %508 = vsyncadd [#allocation3], 4294967264 }
 0x114   :  { %376 = vsyncpa [#allocation3], 1 }

</bundles_post_ra>
